<compile_context>
chip_gen: v6e
topology: v6e:2x2x1
jax: 0.10.0
libtpu: 0.0.40
codegen_flags: <defaults>
</compile_context>

<pallas_src>
import functools
import math

import jax
import jax.numpy as jnp
from jax import lax
from jax.experimental import pallas as pl
from jax.experimental.pallas import tpu as pltpu


def _fade_kernel(x_ref, o_ref, *, total_len, fade_in_len, fade_out_len):
    tb = x_ref.shape[-1]              # static time extent of this block
    j = pl.program_id(1)              # time-tile index
    tile_start = j * tb
    tile_end = tile_start + tb

    # A tile fully inside [fade_in_len, total_len - fade_out_len) needs no gain.
    interior = jnp.logical_and(
        tile_start >= fade_in_len, tile_end <= total_len - fade_out_len
    )

    @pl.when(interior)
    def _copy():
        o_ref[...] = x_ref[...]

    @pl.when(jnp.logical_not(interior))
    def _faded():
        # Global sample index along the lane (time) axis, exact in int32.
        t_idx = tile_start + lax.broadcasted_iota(jnp.int32, (1, tb), 1)

        gain = None
        if fade_in_len > 0:
            # linspace(0, 1, fiop)[t] = t / (fiop - 1); clamp handles t >= fiop.
            in_scale = 1.0 / float(max(fade_in_len - 1, 1))
            gain = jnp.clip(t_idx.astype(jnp.float32) * in_scale, 0.0, 1.0)
        if fade_out_len > 1:
            # 1 - linspace(0,1,fiop) reversed in time = (T-1-t) / (fiop-1).
            out_scale = 1.0 / float(max(fade_out_len - 1, 1))
            rem = (total_len - 1) - t_idx            # exact int32 arithmetic
            g_out = jnp.clip(rem.astype(jnp.float32) * out_scale, 0.0, 1.0)
            gain = g_out if gain is None else gain * g_out

        if gain is None:
            o_ref[...] = x_ref[...]
        else:
            # gain (1, tb) broadcasts over the rows (sublane) axis.
            o_ref[...] = (x_ref[...].astype(jnp.float32) * gain).astype(o_ref.dtype)


def fade(
    waveform,
    *,
    fio=0.1,
    sample_rate=32000,
    audio_length=5,
    r_tile=256,
    t_tile=2048,
    donate_input=False,
):
    """Apply linear fade-in/out to waveform of shape (..., T)."""
    fiop = int(fio * sample_rate * audio_length)

    orig_shape = waveform.shape
    T = orig_shape[-1]
    rows = math.prod(orig_shape[:-1]) if len(orig_shape) > 1 else 1
    x = waveform.reshape(rows, T)

    # Block shape: either the full dim, or a (8,128)-aligned tile with a
    # cdiv grid (Pallas masks the partial edge blocks).
    rb = rows if rows <= r_tile else r_tile
    tb = T if T <= t_tile else t_tile
    if rb != rows:
        assert rb % 8 == 0, "r_tile must be a multiple of 8"
    if tb != T:
        assert tb % 128 == 0, "t_tile must be a multiple of 128"
    grid = (pl.cdiv(rows, rb), pl.cdiv(T, tb))

    kernel = functools.partial(
        _fade_kernel, total_len=T, fade_in_len=fiop, fade_out_len=fiop
    )

    out = pl.pallas_call(
        kernel,
        out_shape=jax.ShapeDtypeStruct((rows, T), waveform.dtype),
        grid_spec=pltpu.PrefetchScalarGridSpec(
            num_scalar_prefetch=0,
            grid=grid,
            in_specs=[pl.BlockSpec((rb, tb), lambda i, j: (i, j))],
            out_specs=pl.BlockSpec((rb, tb), lambda i, j: (i, j)),
        ),
        compiler_params=pltpu.CompilerParams(
            dimension_semantics=("parallel", "parallel")
        ),
        input_output_aliases={0: 0} if donate_input else {},
    )(x)

    return out.reshape(orig_shape)


def fade_reference(waveform, *, fio=0.1, sample_rate=32000, audio_length=5):
    """Plain-JAX reference mirroring torchaudio.transforms.Fade (linear shape)."""
    fiop = int(fio * sample_rate * audio_length)
    T = waveform.shape[-1]

    if fiop > 0:
        fade_in = jnp.concatenate([jnp.linspace(0.0, 1.0, fiop), jnp.ones(T - fiop)])
        fade_out = jnp.concatenate(
            [jnp.ones(T - fiop), 1.0 - jnp.linspace(0.0, 1.0, fiop)]
        )
    else:
        fade_in = jnp.ones(T)
        fade_out = jnp.ones(T)
    fade_in = jnp.clip(fade_in, 0.0, 1.0)
    fade_out = jnp.clip(fade_out, 0.0, 1.0)

    return (waveform * fade_in * fade_out).astype(waveform.dtype)


if __name__ == "__main__":
    # Test 1: TPU-friendly, evenly tiled config.
    # fiop = int(0.125 * 1024 * 2) = 256, T = 2048, rows = 8.
    fio, sr, al = 0.125, 1024, 2
    B, C = 2, 4
    T = sr * al
    wav = jax.random.normal(jax.random.PRNGKey(0), (B, C, T), dtype=jnp.float32)

    out = jax.block_until_ready(
        fade(wav, fio=fio, sample_rate=sr, audio_length=al)
    )
    ref = fade_reference(wav, fio=fio, sample_rate=sr, audio_length=al)
    assert out.shape == wav.shape and out.dtype == wav.dtype
    assert jnp.allclose(out, ref, atol=1e-5, rtol=1e-5), "mismatch vs reference (test 1)"

    # Test 2: ragged case — rows (20) and T (1000) are not multiples of the
    # block shape; exercises cdiv grid + partial-block masking.
    fio2, sr2, al2 = 0.1, 500, 2      # fiop = 100, T = 1000
    B2, C2 = 4, 5                     # rows = 20
    T2 = sr2 * al2
    wav2 = jax.random.normal(jax.random.PRNGKey(1), (B2, C2, T2), dtype=jnp.float32)

    out2 = jax.block_until_ready(
        fade(wav2, fio=fio2, sample_rate=sr2, audio_length=al2, r_tile=8, t_tile=256)
    )
    ref2 = fade_reference(wav2, fio=fio2, sample_rate=sr2, audio_length=al2)
    assert out2.shape == wav2.shape and out2.dtype == wav2.dtype
    assert jnp.allclose(out2, ref2, atol=1e-5, rtol=1e-5), "mismatch vs reference (test 2)"

    print("KERNEL_OK")
</pallas_src>

<mosaic_0001>
module attributes {stable_mosaic.version = 11 : i64} {
  func.func @_fade_kernel(%arg0: i32, %arg1: i32, %arg2: memref<8x2048xf32, #tpu.memory_space<vmem>>, %arg3: memref<8x2048xf32, #tpu.memory_space<vmem>>) attributes {dimension_semantics = [#tpu.dimension_semantics<parallel>, #tpu.dimension_semantics<parallel>], iteration_bounds = array<i64: 1, 1>, scalar_prefetch = 0 : i64, scratch_operands = 0 : i64, tpu.core_type = #tpu.core_type<tc>, window_params = [{transform_indices = @transform_0, window_bounds = array<i64: 8, 2048>}, {transform_indices = @transform_1, window_bounds = array<i64: 8, 2048>}]} {
    %c2048_i32 = arith.constant 2048 : i32
    %0 = arith.muli %arg1, %c2048_i32 : i32
    %c2048_i32_0 = arith.constant 2048 : i32
    %1 = arith.addi %0, %c2048_i32_0 : i32
    %c256_i32 = arith.constant 256 : i32
    %2 = arith.cmpi sge, %0, %c256_i32 : i32
    %c1792_i32 = arith.constant 1792 : i32
    %3 = arith.cmpi sle, %1, %c1792_i32 : i32
    %4 = arith.andi %2, %3 : i1
    %5 = arith.extui %4 : i1 to i32
    %c0_i32 = arith.constant 0 : i32
    %6 = arith.cmpi ne, %5, %c0_i32 : i32
    scf.if %6 {
      %c0 = arith.constant 0 : index
      %c0_2 = arith.constant 0 : index
      %10 = vector.load %arg2[%c0, %c0_2] : memref<8x2048xf32, #tpu.memory_space<vmem>>, vector<8x2048xf32>
      %c0_3 = arith.constant 0 : index
      %c0_4 = arith.constant 0 : index
      %11 = vector.load %arg3[%c0_3, %c0_4] : memref<8x2048xf32, #tpu.memory_space<vmem>>, vector<8x2048xf32>
      tpu.vector_store %arg3[%c0_3, %c0_4], %10 {strides = array<i32>} : memref<8x2048xf32, #tpu.memory_space<vmem>>, vector<8x2048xf32>,
    } else {
    }
    %true = arith.constant true
    %7 = arith.xori %4, %true : i1
    %8 = arith.extui %7 : i1 to i32
    %c0_i32_1 = arith.constant 0 : i32
    %9 = arith.cmpi ne, %8, %c0_i32_1 : i32
    scf.if %9 {
      %10 = tpu.iota {dimensions = array<i32: 1>} : vector<1x2048xi32>
      %11 = vector.broadcast %0 : i32 to vector<1x2048xi32>
      %12 = arith.addi %11, %10 : vector<1x2048xi32>
      %13 = arith.sitofp %12 : vector<1x2048xi32> to vector<1x2048xf32>
      %cst = arith.constant 0.00392156886 : f32
      %14 = vector.broadcast %cst : f32 to vector<1x2048xf32>
      %15 = arith.mulf %13, %14 : vector<1x2048xf32>
      %cst_2 = arith.constant 0.000000e+00 : f32
      %cst_3 = arith.constant 1.000000e+00 : f32
      %16 = vector.broadcast %cst_2 : f32 to vector<1x2048xf32>
      %17 = arith.maximumf %16, %15 : vector<1x2048xf32>
      %18 = vector.broadcast %cst_3 : f32 to vector<1x2048xf32>
      %19 = arith.minimumf %18, %17 : vector<1x2048xf32>
      %c2047_i32 = arith.constant 2047 : i32
      %20 = vector.broadcast %c2047_i32 : i32 to vector<1x2048xi32>
      %21 = arith.subi %20, %12 : vector<1x2048xi32>
      %22 = arith.sitofp %21 : vector<1x2048xi32> to vector<1x2048xf32>
      %cst_4 = arith.constant 0.00392156886 : f32
      %23 = vector.broadcast %cst_4 : f32 to vector<1x2048xf32>
      %24 = arith.mulf %22, %23 : vector<1x2048xf32>
      %cst_5 = arith.constant 0.000000e+00 : f32
      %cst_6 = arith.constant 1.000000e+00 : f32
      %25 = vector.broadcast %cst_5 : f32 to vector<1x2048xf32>
      %26 = arith.maximumf %25, %24 : vector<1x2048xf32>
      %27 = vector.broadcast %cst_6 : f32 to vector<1x2048xf32>
      %28 = arith.minimumf %27, %26 : vector<1x2048xf32>
      %29 = arith.mulf %19, %28 : vector<1x2048xf32>
      %c0 = arith.constant 0 : index
      %c0_7 = arith.constant 0 : index
      %30 = vector.load %arg2[%c0, %c0_7] : memref<8x2048xf32, #tpu.memory_space<vmem>>, vector<8x2048xf32>
      %31 = vector.broadcast %29 : vector<1x2048xf32> to vector<8x2048xf32>
      %32 = arith.mulf %30, %31 : vector<8x2048xf32>
      %c0_8 = arith.constant 0 : index
      %c0_9 = arith.constant 0 : index
      %33 = vector.load %arg3[%c0_8, %c0_9] : memref<8x2048xf32, #tpu.memory_space<vmem>>, vector<8x2048xf32>
      tpu.vector_store %arg3[%c0_8, %c0_9], %32 {strides = array<i32>} : memref<8x2048xf32, #tpu.memory_space<vmem>>, vector<8x2048xf32>,
    } else {
    }
    return
  }
  func.func @transform_0(%arg0: i32, %arg1: i32) -> (i32, i32) {
    %c0_i32 = arith.constant 0 : i32
    return %arg0, %arg1 : i32, i32
  }
  func.func @transform_1(%arg0: i32, %arg1: i32) -> (i32, i32) {
    %c0_i32 = arith.constant 0 : i32
    return %arg0, %arg1 : i32, i32
  }
}

</mosaic_0001>

<bundles_post_ra>
// kernel: tpu_custom_call.1
= control target key start
LH: loop header
LB: loop body
LE: loop exit
PB: predicated region body
PF: predicated region fallthrough
CT: control target
= control target key end

     0   :  { %6 = vsyncpa [#allocation3], 0  ;;  %s408_s0 = inlined_call_operand.hbm [shape: f32[8,2048], index: 0, kind: input, shape index: {}]   ;;  %s409_s1 = inlined_call_operand.hbm [shape: f32[8,2048], index: 1, kind: output, shape index: {}]  }
   0x1   :  { %7 = vsyncpa [#allocation4], 0  ;;  %s367_s6 = smov [#allocation2]  }
   0x2   :  { %s14_s7 = sshll.u32 %s367_s6, 4  ;;  %s15_s7 = int_to_ptr.vmem [resolvable:$true] %s14_s7 }
   0x3   :  { %s331_s8 = scalar_lea.vmem %s15_s7, 2048  ;;  %p336_p1 = scmp.lt.s32.totalorder %s15_s7, %s15_s7 }
   0x4   :  { %p332_p0 = scmp.ne.s32.totalorder %s15_s7, %s331_s8  ;;  %p337_p2 = scmp.lt.s32.totalorder %s331_s8, %s331_s8 }
   0x6   :  { %p338_p3 = por %p337_p2, %p336_p1 }
   0x8   :  { %p339_p4 = pnand %p338_p3, %p332_p0 }
   0xa   :  { %342 = shalt.err (!%p339_p4)
}
   0xb   :  { %17 = dma.hbm_to_vmem [thread:$0]  %s408_s0, 2048, %s15_s7, [#allocation3]  }
   0xc   :  { %363 = dma.done.wait [#allocation3], 2048  }
   0xd   :  { %364 = vsyncadd [#allocation3], 4294965248  ;;  %v64_v0 = vlaneseq  ;;  %v258_v38 = vld [vmem:[#allocation2] sm:$0xff]  ;;  %v259_v47 = vld [vmem:[#allocation2 + $0x8] sm:$0xff]  ;;  %s368_s0 = smov [#allocation5]  }
   0xe   :  { %v260_v54 = vld [vmem:[#allocation2 + $0x10] sm:$0xff]  ;;  %v261_v55 = vld [vmem:[#allocation2 + $0x18] sm:$0xff]  ;;  %s312_s11 = sshll.u32 %s368_s0, 4  ;;  %s313_s11 = int_to_ptr.vmem [resolvable:$true] %s312_s11 }
   0xf   :  { %v382_v1 = vand.u32 127, %v64_v0  ;;  %s343_s12 = scalar_lea.vmem %s313_s11, 2048  ;;  %p348_p6 = scmp.lt.s32.totalorder %s313_s11, %s313_s11 }
  0x10   :  { %p344_p5 = scmp.ne.s32.totalorder %s313_s11, %s343_s12  ;;  %p349_p7 = scmp.lt.s32.totalorder %s343_s12, %s343_s12 }
  0x11   :  { %v98_v2 = vcvt.s32.f32 %v382_v1  ;;  %v162_v3 = vsub.s32 2047, %v382_v1  ;;  %v66_v4 = vadd.s32 128, %v382_v1  ;;  %v67_v5 = vadd.s32 256, %v382_v1 }
  0x12   :  { %v68_v6 = vadd.s32 384, %v382_v1  ;;  %v69_v7 = vadd.s32 512, %v382_v1  ;;  %v70_v8 = vadd.s32 640, %v382_v1  ;;  %v392_v9 = vadd.s32 768, %v382_v1  ;;  %p350_p8 = por %p349_p7, %p348_p6 }
  0x13   :  { %v114_v10 = vmul.f32 0.003921569, %v98_v2  ;;  %v178_v11 = vcvt.s32.f32 %v162_v3  ;;  %v99_v12 = vcvt.s32.f32 %v66_v4  ;;  %v163_v13 = vsub.s32 2047, %v66_v4 }
  0x14   :  { %v100_v14 = vcvt.s32.f32 %v67_v5  ;;  %v164_v15 = vsub.s32 2047, %v67_v5  ;;  %v101_v16 = vcvt.s32.f32 %v68_v6  ;;  %v165_v17 = vsub.s32 2047, %v68_v6  ;;  %p351_p9 = pnand %p350_p8, %p344_p5 }
  0x15   :  { %v130_v18 = vmax.f32 %v114_v10, 0.0  ;;  %v194_v19 = vmul.f32 0.003921569, %v178_v11  ;;  %v115_v20 = vmul.f32 0.003921569, %v99_v12  ;;  %v179_v21 = vcvt.s32.f32 %v163_v13 }
  0x16   :  { %v116_v22 = vmul.f32 0.003921569, %v100_v14  ;;  %v180_v23 = vcvt.s32.f32 %v164_v15  ;;  %v117_v24 = vmul.f32 0.003921569, %v101_v16  ;;  %v181_v25 = vcvt.s32.f32 %v165_v17 }
  0x17   :  { %v146_v26 = vmin.f32 %v130_v18, 1.0  ;;  %v210_v27 = vmax.f32 %v194_v19, 0.0  ;;  %v131_v28 = vmax.f32 %v115_v20, 0.0  ;;  %v195_v29 = vmul.f32 0.003921569, %v179_v21  ;;  %v262_v20 = vld [vmem:[#allocation2 + $0x20] sm:$0xff] }
  0x18   :  { %v132_v30 = vmax.f32 %v116_v22, 0.0  ;;  %v196_v31 = vmul.f32 0.003921569, %v180_v23  ;;  %v133_v32 = vmax.f32 %v117_v24, 0.0  ;;  %v197_v33 = vmul.f32 0.003921569, %v181_v25 }
  0x19   :  { %v226_v34 = vmin.f32 %v210_v27, 1.0  ;;  %v147_v35 = vmin.f32 %v131_v28, 1.0  ;;  %v211_v36 = vmax.f32 %v195_v29, 0.0  ;;  %v102_v37 = vcvt.s32.f32 %v69_v7  ;;  %v263_v25 = vld [vmem:[#allocation2 + $0x28] sm:$0xff] }
  0x1a   :  { %v148_v39 = vmin.f32 %v132_v30, 1.0  ;;  %v212_v40 = vmax.f32 %v196_v31, 0.0  ;;  %v149_v41 = vmin.f32 %v133_v32, 1.0  ;;  %v213_v42 = vmax.f32 %v197_v33, 0.0 }
  0x1b   :  { %v242_v43 = vmul.f32 %v226_v34, %v146_v26  ;;  %v227_v44 = vmin.f32 %v211_v36, 1.0  ;;  %v118_v45 = vmul.f32 0.003921569, %v102_v37  ;;  %v166_v46 = vsub.s32 2047, %v69_v7 }
  0x1c   :  { %v228_v48 = vmin.f32 %v212_v40, 1.0  ;;  %v229_v49 = vmin.f32 %v213_v42, 1.0  ;;  %v103_v50 = vcvt.s32.f32 %v70_v8  ;;  %v167_v51 = vsub.s32 2047, %v70_v8 }
  0x1d   :  { %v274_v52 = vmul.f32 %v258_v38, %v242_v43  ;;  %v243_v53 = vmul.f32 %v227_v44, %v147_v35  ;;  %v134_v56 = vmax.f32 %v118_v45, 0.0  ;;  %v182_v57 = vcvt.s32.f32 %v166_v46  ;;  %v264_v45 = vld [vmem:[#allocation2 + $0x30] sm:$0xff] }
  0x1e   :  { %v244_v58 = vmul.f32 %v228_v48, %v148_v39  ;;  %v245_v59 = vmul.f32 %v229_v49, %v149_v41  ;;  %v119_v60 = vmul.f32 0.003921569, %v103_v50  ;;  %v183_v61 = vcvt.s32.f32 %v167_v51 }
  0x1f   :  { %290 = vst [vmem:[#allocation5] sm:$0xff] %v274_v52  ;;  %v275_v62 = vmul.f32 %v259_v47, %v243_v53  ;;  %v150_v63 = vmin.f32 %v134_v56, 1.0  ;;  %v198_v0 = vmul.f32 0.003921569, %v182_v57  ;;  %v104_v2 = vcvt.s32.f32 %v392_v9 }
  0x20   :  { %v276_v3 = vmul.f32 %v260_v54, %v244_v58  ;;  %v277_v4 = vmul.f32 %v261_v55, %v245_v59  ;;  %v135_v5 = vmax.f32 %v119_v60, 0.0  ;;  %v199_v6 = vmul.f32 0.003921569, %v183_v61  ;;  %v265_v59 = vld [vmem:[#allocation2 + $0x38] sm:$0xff]  ;;  %v266_v60 = vld [vmem:[#allocation2 + $0x40] sm:$0xff] }
  0x21   :  { %291 = vst [vmem:[#allocation5 + $0x8] sm:$0xff] %v275_v62  ;;  %v214_v7 = vmax.f32 %v198_v0, 0.0  ;;  %v120_v8 = vmul.f32 0.003921569, %v104_v2  ;;  %v168_v10 = vsub.s32 2047, %v392_v9  ;;  %v72_v11 = vadd.s32 896, %v382_v1 }
  0x22   :  { %292 = vst [vmem:[#allocation5 + $0x10] sm:$0xff] %v276_v3  ;;  %293 = vst [vmem:[#allocation5 + $0x18] sm:$0xff] %v277_v4  ;;  %v151_v12 = vmin.f32 %v135_v5, 1.0  ;;  %v215_v13 = vmax.f32 %v199_v6, 0.0  ;;  %v73_v14 = vadd.s32 1024, %v382_v1  ;;  %v74_v15 = vadd.s32 1152, %v382_v1 }
  0x23   :  { %v230_v16 = vmin.f32 %v214_v7, 1.0  ;;  %v136_v17 = vmax.f32 %v120_v8, 0.0  ;;  %v184_v18 = vcvt.s32.f32 %v168_v10  ;;  %v105_v19 = vcvt.s32.f32 %v72_v11 }
  0x24   :  { %v231_v21 = vmin.f32 %v215_v13, 1.0  ;;  %v169_v22 = vsub.s32 2047, %v72_v11  ;;  %v106_v23 = vcvt.s32.f32 %v73_v14  ;;  %v170_v24 = vsub.s32 2047, %v73_v14 }
  0x25   :  { %v246_v9 = vmul.f32 %v230_v16, %v150_v63  ;;  %v152_v26 = vmin.f32 %v136_v17, 1.0  ;;  %v200_v27 = vmul.f32 0.003921569, %v184_v18  ;;  %v121_v28 = vmul.f32 0.003921569, %v105_v19  ;;  %v267_v18 = vld [vmem:[#allocation2 + $0x48] sm:$0xff] }
  0x26   :  { %v247_v29 = vmul.f32 %v231_v21, %v151_v12  ;;  %v185_v30 = vcvt.s32.f32 %v169_v22  ;;  %v122_v31 = vmul.f32 0.003921569, %v106_v23  ;;  %v186_v32 = vcvt.s32.f32 %v170_v24 }
  0x27   :  { %v278_v33 = vmul.f32 %v262_v20, %v246_v9  ;;  %v216_v34 = vmax.f32 %v200_v27, 0.0  ;;  %v137_v35 = vmax.f32 %v121_v28, 0.0  ;;  %v107_v36 = vcvt.s32.f32 %v74_v15 }
  0x28   :  { %v279_v37 = vmul.f32 %v263_v25, %v247_v29  ;;  %v201_v38 = vmul.f32 0.003921569, %v185_v30  ;;  %v138_v39 = vmax.f32 %v122_v31, 0.0  ;;  %v202_v40 = vmul.f32 0.003921569, %v186_v32  ;;  %v268_v31 = vld [vmem:[#allocation2 + $0x50] sm:$0xff] }
  0x29   :  { %294 = vst [vmem:[#allocation5 + $0x20] sm:$0xff] %v278_v33  ;;  %v232_v41 = vmin.f32 %v216_v34, 1.0  ;;  %v153_v42 = vmin.f32 %v137_v35, 1.0  ;;  %v123_v43 = vmul.f32 0.003921569, %v107_v36  ;;  %v171_v44 = vsub.s32 2047, %v74_v15 }
  0x2a   :  { %295 = vst [vmem:[#allocation5 + $0x28] sm:$0xff] %v279_v37  ;;  %v217_v46 = vmax.f32 %v201_v38, 0.0  ;;  %v154_v47 = vmin.f32 %v138_v39, 1.0  ;;  %v218_v48 = vmax.f32 %v202_v40, 0.0  ;;  %v75_v49 = vadd.s32 1280, %v382_v1 }
  0x2b   :  { %v248_v50 = vmul.f32 %v232_v41, %v152_v26  ;;  %v139_v51 = vmax.f32 %v123_v43, 0.0  ;;  %v187_v52 = vcvt.s32.f32 %v171_v44  ;;  %v76_v53 = vadd.s32 1408, %v382_v1  ;;  %v269_v44 = vld [vmem:[#allocation2 + $0x58] sm:$0xff] }
  0x2c   :  { %v233_v54 = vmin.f32 %v217_v46, 1.0  ;;  %v234_v55 = vmin.f32 %v218_v48, 1.0  ;;  %v108_v56 = vcvt.s32.f32 %v75_v49  ;;  %v172_v57 = vsub.s32 2047, %v75_v49 }
  0x2d   :  { %v280_v58 = vmul.f32 %v264_v45, %v248_v50  ;;  %v155_v61 = vmin.f32 %v139_v51, 1.0  ;;  %v203_v62 = vmul.f32 0.003921569, %v187_v52  ;;  %v109_v63 = vcvt.s32.f32 %v76_v53 }
  0x2e   :  { %v249_v0 = vmul.f32 %v233_v54, %v153_v42  ;;  %v250_v2 = vmul.f32 %v234_v55, %v154_v47  ;;  %v124_v3 = vmul.f32 0.003921569, %v108_v56  ;;  %v188_v4 = vcvt.s32.f32 %v172_v57  ;;  %v270_v56 = vld [vmem:[#allocation2 + $0x60] sm:$0xff] }
  0x2f   :  { %296 = vst [vmem:[#allocation5 + $0x30] sm:$0xff] %v280_v58  ;;  %v219_v5 = vmax.f32 %v203_v62, 0.0  ;;  %v125_v6 = vmul.f32 0.003921569, %v109_v63  ;;  %v173_v7 = vsub.s32 2047, %v76_v53  ;;  %v77_v8 = vadd.s32 1536, %v382_v1 }
  0x30   :  { %v281_v10 = vmul.f32 %v265_v59, %v249_v0  ;;  %v282_v11 = vmul.f32 %v266_v60, %v250_v2  ;;  %v140_v12 = vmax.f32 %v124_v3, 0.0  ;;  %v204_v13 = vmul.f32 0.003921569, %v188_v4  ;;  %v271_v63 = vld [vmem:[#allocation2 + $0x68] sm:$0xff] }
  0x31   :  { %v235_v14 = vmin.f32 %v219_v5, 1.0  ;;  %v141_v15 = vmax.f32 %v125_v6, 0.0  ;;  %v189_v16 = vcvt.s32.f32 %v173_v7  ;;  %v110_v17 = vcvt.s32.f32 %v77_v8 }
  0x32   :  { %297 = vst [vmem:[#allocation5 + $0x38] sm:$0xff] %v281_v10  ;;  %298 = vst [vmem:[#allocation5 + $0x40] sm:$0xff] %v282_v11  ;;  %v156_v19 = vmin.f32 %v140_v12, 1.0  ;;  %v220_v20 = vmax.f32 %v204_v13, 0.0  ;;  %v174_v21 = vsub.s32 2047, %v77_v8  ;;  %v78_v22 = vadd.s32 1664, %v382_v1 }
  0x33   :  { %v251_v23 = vmul.f32 %v235_v14, %v155_v61  ;;  %v157_v24 = vmin.f32 %v141_v15, 1.0  ;;  %v205_v9 = vmul.f32 0.003921569, %v189_v16  ;;  %v126_v25 = vmul.f32 0.003921569, %v110_v17  ;;  %v272_v10 = vld [vmem:[#allocation2 + $0x70] sm:$0xff] }
  0x34   :  { %v236_v26 = vmin.f32 %v220_v20, 1.0  ;;  %v190_v27 = vcvt.s32.f32 %v174_v21  ;;  %v111_v28 = vcvt.s32.f32 %v78_v22  ;;  %v175_v29 = vsub.s32 2047, %v78_v22  ;;  %v273_v17 = vld [vmem:[#allocation2 + $0x78] sm:$0xff] }
  0x35   :  { %v283_v30 = vmul.f32 %v267_v18, %v251_v23  ;;  %v221_v32 = vmax.f32 %v205_v9, 0.0  ;;  %v142_v33 = vmax.f32 %v126_v25, 0.0  ;;  %v79_v34 = vadd.s32 1792, %v382_v1 }
  0x36   :  { %v252_v35 = vmul.f32 %v236_v26, %v156_v19  ;;  %v206_v36 = vmul.f32 0.003921569, %v190_v27  ;;  %v127_v37 = vmul.f32 0.003921569, %v111_v28  ;;  %v191_v38 = vcvt.s32.f32 %v175_v29 }
  0x37   :  { %299 = vst [vmem:[#allocation5 + $0x48] sm:$0xff] %v283_v30  ;;  %v237_v39 = vmin.f32 %v221_v32, 1.0  ;;  %v158_v40 = vmin.f32 %v142_v33, 1.0  ;;  %v112_v41 = vcvt.s32.f32 %v79_v34  ;;  %v176_v42 = vsub.s32 2047, %v79_v34 }
  0x38   :  { %v284_v43 = vmul.f32 %v268_v31, %v252_v35  ;;  %v222_v45 = vmax.f32 %v206_v36, 0.0  ;;  %v143_v46 = vmax.f32 %v127_v37, 0.0  ;;  %v207_v47 = vmul.f32 0.003921569, %v191_v38 }
  0x39   :  { %v253_v48 = vmul.f32 %v237_v39, %v157_v24  ;;  %v128_v49 = vmul.f32 0.003921569, %v112_v41  ;;  %v192_v50 = vcvt.s32.f32 %v176_v42  ;;  %v80_v51 = vadd.s32 1920, %v382_v1 }
  0x3a   :  { %300 = vst [vmem:[#allocation5 + $0x50] sm:$0xff] %v284_v43  ;;  %v238_v52 = vmin.f32 %v222_v45, 1.0  ;;  %v159_v53 = vmin.f32 %v143_v46, 1.0  ;;  %v223_v54 = vmax.f32 %v207_v47, 0.0 }
  0x3b   :  { %v285_v55 = vmul.f32 %v269_v44, %v253_v48  ;;  %v144_v57 = vmax.f32 %v128_v49, 0.0  ;;  %v208_v58 = vmul.f32 0.003921569, %v192_v50  ;;  %v113_v59 = vcvt.s32.f32 %v80_v51 }
  0x3c   :  { %v254_v60 = vmul.f32 %v238_v52, %v158_v40  ;;  %v239_v61 = vmin.f32 %v223_v54, 1.0  ;;  %v177_v62 = vsub.s32 2047, %v80_v51 }
  0x3d   :  { %301 = vst [vmem:[#allocation5 + $0x58] sm:$0xff] %v285_v55  ;;  %v160_v0 = vmin.f32 %v144_v57, 1.0  ;;  %v224_v2 = vmax.f32 %v208_v58, 0.0  ;;  %v129_v3 = vmul.f32 0.003921569, %v113_v59 }
  0x3e   :  { %v286_v4 = vmul.f32 %v270_v56, %v254_v60  ;;  %v255_v5 = vmul.f32 %v239_v61, %v159_v53  ;;  %v193_v1 = vcvt.s32.f32 %v177_v62 }
  0x3f   :  { %v240_v6 = vmin.f32 %v224_v2, 1.0  ;;  %v145_v7 = vmax.f32 %v129_v3, 0.0 }
  0x40   :  { %302 = vst [vmem:[#allocation5 + $0x60] sm:$0xff] %v286_v4  ;;  %v287_v8 = vmul.f32 %v271_v63, %v255_v5  ;;  %v209_v11 = vmul.f32 0.003921569, %v193_v1 }
  0x41   :  { %v256_v12 = vmul.f32 %v240_v6, %v160_v0  ;;  %v161_v13 = vmin.f32 %v145_v7, 1.0 }
  0x42   :  { %303 = vst [vmem:[#allocation5 + $0x68] sm:$0xff] %v287_v8  ;;  %v225_v14 = vmax.f32 %v209_v11, 0.0 }
  0x43   :  { %v288_v15 = vmul.f32 %v272_v10, %v256_v12 }
  0x44   :  { %v241_v16 = vmin.f32 %v225_v14, 1.0 }
  0x45   :  { %304 = vst [vmem:[#allocation5 + $0x70] sm:$0xff] %v288_v15 }
  0x46   :  { %v257_v18 = vmul.f32 %v241_v16, %v161_v13 }
  0x48   :  { %v289_v19 = vmul.f32 %v273_v17, %v257_v18 }
  0x4a   :  { %305 = vst [vmem:[#allocation5 + $0x78] sm:$0xff] %v289_v19 }
  0x4b   :  { %354 = shalt.err (!%p351_p9)
}
  0x4c   :  { %315 = dma.vmem_to_hbm [thread:$0]  %s313_s11, 2048, %s409_s1, [#allocation4]  }
  0x4d   :  { %365 = dma.done.wait [#allocation4], 2048  }
  0x4e   :  { %366 = vsyncadd [#allocation4], 4294965248 }
  0x4f   :  { %319 = vsyncpa [#allocation3], 1 }
  0x50   :  { %320 = vsyncpa [#allocation4], 1 }

</bundles_post_ra>
